<compile_context>
chip_gen: v5e
topology: v5e:2x2
jax: 0.10.0
libtpu: 0.0.40
codegen_flags: <defaults>
</compile_context>

<pallas_src>
import jax
import jax.numpy as jnp
from jax import lax
from jax.experimental import pallas as pl
from jax.experimental.pallas import tpu as pltpu


def _round_up(x, m):
    return ((x + m - 1) // m) * m


def _choose_tile_l(L, c_in_g, c_out_g, K, zeros, in_item, out_item):
    """Pick a length tile: multiple of 128 (and of the halo block), VMEM-budgeted."""
    if L <= 1024:
        return L  # single block; block dim == full array dim is always legal
    budget = 8 << 20  # per-step x/out/temp budget; safe on v5e/v6e/v7x scoped VMEM
    per_col = (in_item * (2 * c_in_g + (K + 1) * c_in_g)
               + out_item * 2 * c_out_g + 4 * c_out_g)
    t = budget // max(per_col, 1)
    t = max(256, min(4096, (t // 128) * 128))
    if zeros > 0:
        halo_blk = _round_up(zeros, 128)
        t = max(_round_up(t, halo_blk), halo_blk)
    if t >= L:
        return L
    return int(t)


def _choose_bt(B, per_row_bytes):
    """Batch rows per grid step: amortize ~0.35us fixed step cost, stay in budget."""
    target = 512 << 10
    budget = 8 << 20
    want = max(1, target // max(per_row_bytes, 1))
    want = min(want, B, 8, max(1, budget // max(per_row_bytes, 1)))
    for bt in range(int(want), 0, -1):
        if B % bt == 0:
            return bt
    return 1


def _vmem_estimate(Bt, c_in_g, c_out_g, K, tile_l, halo_blk, in_item, out_item,
                   need_prev):
    """Rough per-step VMEM footprint (double-buffered pipeline + kernel temps)."""
    b = 2 * Bt * c_in_g * tile_l * in_item                       # x cur
    if need_prev:
        b += 2 * Bt * c_in_g * halo_blk * in_item                # halo
    b += 2 * Bt * c_out_g * tile_l * out_item                    # out
    b += 2 * (c_out_g * K * c_in_g * in_item + 4 * c_out_g)      # weight + bias
    # window + stacked RHS + f32 accumulator (assume ~2 live copies)
    b += 2 * ((K + 1) * c_in_g * (tile_l + max(halo_blk, 128)) * in_item
              + 4 * c_out_g * tile_l)
    return int(b)


def causal_conv1d(x, weight, bias, *, kernel_size, dilation=1, groups=1,
                  compute_dtype=None, tile_l=None, batch_tile=None):
    """Causal 1D convolution (training-mode forward of CausalConv1d).

    x      : (B, C_in, L)            (PyTorch NCL layout)
    weight : (C_out, C_in//g, K)     (PyTorch Conv1d weight layout)
    bias   : (C_out,)
    returns: (B, C_out, L), dtype of x

    compute_dtype: dtype for the MXU operands (bf16 recommended when x is
        already bf16 upstream). NOTE: if x arrives as f32, the wrapper-side
        astype is a real XLA op (an extra HBM pass over x unless fused with the
        producer) — prefer producing bf16 upstream rather than casting here.
    tile_l / batch_tile: optional overrides of the length / batch tiling.
    """
    B, C_in, L = x.shape
    C_out = weight.shape[0]
    G = groups
    c_in_g = C_in // G
    c_out_g = C_out // G
    zeros = (kernel_size - 1) * dilation
    out_dtype = x.dtype
    if compute_dtype is None:
        compute_dtype = x.dtype
    compute_dtype = jnp.dtype(compute_dtype)
    in_item = compute_dtype.itemsize
    out_item = jnp.dtype(out_dtype).itemsize

    # ---- wrapper glue: NCL kept end-to-end; reshapes are bitcasts ----
    x4 = x.reshape(B, G, c_in_g, L).astype(compute_dtype)            # (B,G,Cig,L)
    # Fold the K taps into the contraction axis:
    #   w_flat[g, co, k*Cig + ci] = weight[g*Cog + co, ci, k]
    w_flat = jnp.transpose(
        weight.reshape(G, c_out_g, c_in_g, kernel_size),
        (0, 1, 3, 2)).reshape(G, c_out_g, kernel_size * c_in_g)
    w_flat = w_flat.astype(compute_dtype)                            # (G,Cog,K*Cig)
    b3 = bias.reshape(G, c_out_g, 1).astype(jnp.float32)             # (G,Cog,1)

    # ---- length tiling ----
    if tile_l is None:
        tile_l = _choose_tile_l(L, c_in_g, c_out_g, kernel_size, zeros,
                                in_item, out_item)
    tile_l = int(min(int(tile_l), L))
    if tile_l < L and tile_l % 128 != 0:
        raise ValueError("tile_l must be a multiple of 128 when it does not cover L")
    nt = int(pl.cdiv(L, tile_l))

    need_prev = (zeros > 0) and (nt > 1)
    halo_blk = 0
    blocks_per_tile = 1
    if need_prev:
        # Smallest 128-aligned block covering the causal context of the
        # previous tile (never a whole extra tile -> no duplicated x reads).
        halo_blk = _round_up(zeros, 128)
        if halo_blk > tile_l or tile_l % halo_blk != 0:
            raise ValueError(
                "tile_l must be a multiple of round_up((kernel_size-1)*dilation, 128)")
        blocks_per_tile = tile_l // halo_blk

    # ---- batch tiling (amortize per-step fixed overhead at small widths) ----
    per_row_bytes = tile_l * (
        in_item * (2 * c_in_g + (kernel_size + 1) * c_in_g)
        + out_item * 2 * c_out_g + 4 * c_out_g)
    if batch_tile is None:
        Bt = _choose_bt(B, per_row_bytes)
    else:
        Bt = int(batch_tile)
        if B % Bt != 0:
            raise ValueError("batch_tile must divide the batch size")
    nb = B // Bt

    def kernel(*refs):
        if need_prev:
            x_cur_ref, x_prev_ref, w_ref, b_ref, o_ref = refs
        else:
            x_cur_ref, w_ref, b_ref, o_ref = refs

        j = pl.program_id(2)
        w = w_ref[0]                                  # (Cog, K*Cig)
        bvec = b_ref[0]                               # (Cog, 1)

        for b in range(Bt):                           # static unroll over batch block
            cur = x_cur_ref[b, 0]                     # (Cig, TILE_L)
            if zeros > 0:
                if need_prev:
                    halo = x_prev_ref[b, 0, :, halo_blk - zeros:]   # (Cig, zeros)
                    # First length-tile: causal left-pad == zero halo (NaN-safe).
                    halo = jnp.where(j > 0, halo, jnp.zeros_like(halo))
                else:
                    halo = jnp.zeros((cur.shape[0], zeros), cur.dtype)
                window = jnp.concatenate([halo, cur], axis=-1)      # (Cig, TILE_L+zeros)
            else:
                window = cur

            # One MXU matmul per batch row: stack K shifted views along the
            # contraction axis -> (K*Cig, TILE_L), then dot with flat weights.
            # TODO(synk): on v5e, if the Mosaic dump shows materialized copies
            # for these lane-shifted slices, move the shifts to pltpu.roll.
            if kernel_size == 1:
                stacked = window
            else:
                stacked = jnp.concatenate(
                    [window[:, k * dilation: k * dilation + tile_l]
                     for k in range(kernel_size)], axis=0)
            acc = jnp.dot(w, stacked, preferred_element_type=jnp.float32)
            o_ref[b, 0] = (acc + bvec).astype(o_ref.dtype)          # lane-dense store

    cur_spec = pl.BlockSpec((Bt, 1, c_in_g, tile_l), lambda b, g, j: (b, g, 0, j))
    w_spec = pl.BlockSpec((1, c_out_g, kernel_size * c_in_g),
                          lambda b, g, j: (g, 0, 0))
    b_spec = pl.BlockSpec((1, c_out_g, 1), lambda b, g, j: (g, 0, 0))
    out_spec = pl.BlockSpec((Bt, 1, c_out_g, tile_l), lambda b, g, j: (b, g, 0, j))

    in_specs = [cur_spec]
    inputs = [x4]
    if need_prev:
        bpt = blocks_per_tile
        prev_spec = pl.BlockSpec(
            (Bt, 1, c_in_g, halo_blk),
            lambda b, g, j: (b, g, 0, jnp.maximum(j * bpt - 1, 0)))
        in_specs.append(prev_spec)
        inputs.append(x4)
    in_specs += [w_spec, b_spec]
    inputs += [w_flat, b3]

    est = _vmem_estimate(Bt, c_in_g, c_out_g, kernel_size, tile_l, halo_blk,
                         in_item, out_item, need_prev)
    # Explicit limit: generous vs the computed footprint but conservative w.r.t.
    # v7x's 64 MiB physical VMEM (and well under v5e/v6e physical).
    vmem_limit = int(min(max(4 * est, 32 << 20), 48 << 20))

    out4 = pl.pallas_call(
        kernel,
        out_shape=jax.ShapeDtypeStruct((B, G, c_out_g, L), out_dtype),
        grid_spec=pltpu.PrefetchScalarGridSpec(
            num_scalar_prefetch=0,
            grid=(nb, G, nt),
            in_specs=in_specs,
            out_specs=out_spec,
        ),
        compiler_params=pltpu.CompilerParams(
            # All axes independent -> all parallel (v7x 2-TC sharding is free).
            dimension_semantics=("parallel", "parallel", "parallel"),
            vmem_limit_bytes=vmem_limit),
    )(*inputs)

    return out4.reshape(B, C_out, L)


def _reference(x, weight, bias, *, kernel_size, dilation, groups):
    """Pure-JAX reference (same math as PyTorch F.pad + F.conv1d)."""
    zeros = (kernel_size - 1) * dilation
    x_pad = jnp.pad(x, ((0, 0), (0, 0), (zeros, 0)))
    out = lax.conv_general_dilated(
        x_pad, weight,
        window_strides=(1,), padding="VALID",
        rhs_dilation=(dilation,),
        dimension_numbers=("NCH", "OIH", "NCH"),
        feature_group_count=groups,
        precision=lax.Precision.HIGHEST)
    return out + bias[None, :, None]


if __name__ == "__main__":
    master = jax.random.PRNGKey(0)

    # (B, C_in, C_out, L, K, dilation, groups, tile_l, compute_dtype, tol)
    cases = [
        (2, 4, 8, 16, 3, 2, 1, None, None, 1e-4),           # module-default config
        (2, 4, 8, 16, 3, 1, 2, None, None, 1e-4),           # grouped conv path
        (2, 4, 8, 16, 1, 1, 1, None, None, 1e-4),           # kernel_size=1 (no pad) path
        (1, 8, 8, 400, 5, 3, 1, 128, None, 1e-4),           # multi-tile + halo + ragged tail
        (1, 8, 8, 1024, 3, 4, 1, 256, None, 1e-4),          # 128-wide halo block
        (4, 8, 8, 512, 3, 2, 1, 128, None, 1e-4),           # batch-blocked (Bt>1) multi-tile
        (1, 8, 8, 1024, 5, 40, 1, 256, None, 1e-4),         # zeros>128 -> 256-wide halo block
        (1, 8, 8, 400, 5, 3, 1, 128, jnp.bfloat16, 5e-2),   # bf16 MXU operands
    ]

    for idx, (B, C_in, C_out, L, K, d, g, tl, cdt, tol) in enumerate(cases):
        key = jax.random.fold_in(master, idx)
        kx, kw, kb = jax.random.split(key, 3)

        x = jax.random.normal(kx, (B, C_in, L), dtype=jnp.float32)
        # nn.Conv1d default init: U(-1/sqrt(fan_in), 1/sqrt(fan_in))
        fan_in = (C_in // g) * K
        bound = 1.0 / (fan_in ** 0.5)
        weight = jax.random.uniform(kw, (C_out, C_in // g, K), jnp.float32,
                                    -bound, bound)
        bias = jax.random.uniform(kb, (C_out,), jnp.float32, -bound, bound)

        out = causal_conv1d(x, weight, bias, kernel_size=K, dilation=d,
                            groups=g, tile_l=tl, compute_dtype=cdt)
        out = jax.block_until_ready(out)

        ref = _reference(x, weight, bias, kernel_size=K, dilation=d, groups=g)
        assert out.shape == (B, C_out, L)
        max_err = float(jnp.max(jnp.abs(out - ref)))
        assert jnp.allclose(out, ref, atol=tol, rtol=tol), (
            f"case {idx} mismatch vs reference conv (max abs err {max_err})")

    print("KERNEL_OK")
</pallas_src>

<mosaic_0001>
module attributes {stable_mosaic.version = 11 : i64} {
  func.func @kernel(%arg0: i32, %arg1: i32, %arg2: i32, %arg3: memref<2x1x4x16xf32, #tpu.memory_space<vmem>>, %arg4: memref<1x8x12xf32, #tpu.memory_space<vmem>>, %arg5: memref<1x8x1xf32, #tpu.memory_space<vmem>>, %arg6: memref<2x1x8x16xf32, #tpu.memory_space<vmem>>) attributes {dimension_semantics = [#tpu.dimension_semantics<parallel>, #tpu.dimension_semantics<parallel>, #tpu.dimension_semantics<parallel>], iteration_bounds = array<i64: 1, 1, 1>, scalar_prefetch = 0 : i64, scratch_operands = 0 : i64, tpu.core_type = #tpu.core_type<tc>, window_params = [{transform_indices = @transform_0, window_bounds = array<i64: 2, 1, 4, 16>}, {transform_indices = @transform_1, window_bounds = array<i64: 1, 8, 12>}, {transform_indices = @transform_2, window_bounds = array<i64: 1, 8, 1>}, {transform_indices = @transform_3, window_bounds = array<i64: 2, 1, 8, 16>}]} {
    %c0 = arith.constant 0 : index
    %c0_0 = arith.constant 0 : index
    %c0_1 = arith.constant 0 : index
    %0 = vector.load %arg4[%c0, %c0_0, %c0_1] : memref<1x8x12xf32, #tpu.memory_space<vmem>>, vector<1x8x12xf32>
    %1 = vector.shape_cast %0 : vector<1x8x12xf32> to vector<8x12xf32>
    %c0_2 = arith.constant 0 : index
    %c0_3 = arith.constant 0 : index
    %c0_4 = arith.constant 0 : index
    %2 = vector.load %arg5[%c0_2, %c0_3, %c0_4] : memref<1x8x1xf32, #tpu.memory_space<vmem>>, vector<1x8x1xf32>
    %3 = vector.shape_cast %2 : vector<1x8x1xf32> to vector<8x1xf32>
    %c0_5 = arith.constant 0 : index
    %c0_6 = arith.constant 0 : index
    %c0_7 = arith.constant 0 : index
    %c0_8 = arith.constant 0 : index
    %4 = vector.load %arg3[%c0_5, %c0_6, %c0_7, %c0_8] : memref<2x1x4x16xf32, #tpu.memory_space<vmem>>, vector<1x1x4x16xf32>
    %5 = vector.shape_cast %4 : vector<1x1x4x16xf32> to vector<4x16xf32>
    %cst = arith.constant 0.000000e+00 : f32
    %6 = vector.broadcast %cst : f32 to vector<4x4xf32>
    %7 = tpu.concatenate %6, %5 in 1 : vector<4x4xf32>, vector<4x16xf32> -> vector<4x20xf32>
    %8 = vector.extract_strided_slice %7 {offsets = [0, 0], sizes = [4, 16], strides = [1, 1]} : vector<4x20xf32> to vector<4x16xf32>
    %9 = vector.extract_strided_slice %7 {offsets = [0, 2], sizes = [4, 16], strides = [1, 1]} : vector<4x20xf32> to vector<4x16xf32>
    %10 = vector.extract_strided_slice %7 {offsets = [0, 4], sizes = [4, 16], strides = [1, 1]} : vector<4x20xf32> to vector<4x16xf32>
    %11 = tpu.concatenate %8, %9, %10 in 0 : vector<4x16xf32>, vector<4x16xf32>, vector<4x16xf32> -> vector<12x16xf32>
    %cst_9 = arith.constant dense<0.000000e+00> : vector<8x16xf32>
    %12 = tpu.matmul %1, %11, %cst_9 {dimension_numbers = #tpu.dot_dimension_numbers<[1], [0], [0], [1], [0, 0, 1, 1], [], []>} : vector<8x12xf32>, vector<12x16xf32>, vector<8x16xf32> -> vector<8x16xf32>
    %13 = vector.broadcast %3 : vector<8x1xf32> to vector<8x16xf32>
    %14 = arith.addf %12, %13 : vector<8x16xf32>
    %c0_10 = arith.constant 0 : index
    %c0_11 = arith.constant 0 : index
    %c0_12 = arith.constant 0 : index
    %c0_13 = arith.constant 0 : index
    %15 = vector.load %arg6[%c0_10, %c0_11, %c0_12, %c0_13] : memref<2x1x8x16xf32, #tpu.memory_space<vmem>>, vector<1x1x8x16xf32>
    %16 = vector.shape_cast %15 : vector<1x1x8x16xf32> to vector<8x16xf32>
    %17 = vector.shape_cast %14 : vector<8x16xf32> to vector<1x1x8x16xf32>
    tpu.vector_store %arg6[%c0_10, %c0_11, %c0_12, %c0_13], %17 {strides = array<i32>} : memref<2x1x8x16xf32, #tpu.memory_space<vmem>>, vector<1x1x8x16xf32>,
    %c1 = arith.constant 1 : index
    %c0_14 = arith.constant 0 : index
    %c0_15 = arith.constant 0 : index
    %c0_16 = arith.constant 0 : index
    %18 = vector.load %arg3[%c1, %c0_14, %c0_15, %c0_16] : memref<2x1x4x16xf32, #tpu.memory_space<vmem>>, vector<1x1x4x16xf32>
    %19 = vector.shape_cast %18 : vector<1x1x4x16xf32> to vector<4x16xf32>
    %cst_17 = arith.constant 0.000000e+00 : f32
    %20 = vector.broadcast %cst_17 : f32 to vector<4x4xf32>
    %21 = tpu.concatenate %20, %19 in 1 : vector<4x4xf32>, vector<4x16xf32> -> vector<4x20xf32>
    %22 = vector.extract_strided_slice %21 {offsets = [0, 0], sizes = [4, 16], strides = [1, 1]} : vector<4x20xf32> to vector<4x16xf32>
    %23 = vector.extract_strided_slice %21 {offsets = [0, 2], sizes = [4, 16], strides = [1, 1]} : vector<4x20xf32> to vector<4x16xf32>
    %24 = vector.extract_strided_slice %21 {offsets = [0, 4], sizes = [4, 16], strides = [1, 1]} : vector<4x20xf32> to vector<4x16xf32>
    %25 = tpu.concatenate %22, %23, %24 in 0 : vector<4x16xf32>, vector<4x16xf32>, vector<4x16xf32> -> vector<12x16xf32>
    %cst_18 = arith.constant dense<0.000000e+00> : vector<8x16xf32>
    %26 = tpu.matmul %1, %25, %cst_18 {dimension_numbers = #tpu.dot_dimension_numbers<[1], [0], [0], [1], [0, 0, 1, 1], [], []>} : vector<8x12xf32>, vector<12x16xf32>, vector<8x16xf32> -> vector<8x16xf32>
    %27 = vector.broadcast %3 : vector<8x1xf32> to vector<8x16xf32>
    %28 = arith.addf %26, %27 : vector<8x16xf32>
    %c1_19 = arith.constant 1 : index
    %c0_20 = arith.constant 0 : index
    %c0_21 = arith.constant 0 : index
    %c0_22 = arith.constant 0 : index
    %29 = vector.load %arg6[%c1_19, %c0_20, %c0_21, %c0_22] : memref<2x1x8x16xf32, #tpu.memory_space<vmem>>, vector<1x1x8x16xf32>
    %30 = vector.shape_cast %29 : vector<1x1x8x16xf32> to vector<8x16xf32>
    %31 = vector.shape_cast %28 : vector<8x16xf32> to vector<1x1x8x16xf32>
    tpu.vector_store %arg6[%c1_19, %c0_20, %c0_21, %c0_22], %31 {strides = array<i32>} : memref<2x1x8x16xf32, #tpu.memory_space<vmem>>, vector<1x1x8x16xf32>,
    return
  }
  func.func @transform_0(%arg0: i32, %arg1: i32, %arg2: i32) -> (i32, i32, i32, i32) {
    %c0_i32 = arith.constant 0 : i32
    %c0_i32_0 = arith.constant 0 : i32
    return %arg0, %arg1, %c0_i32, %arg2 : i32, i32, i32, i32
  }
  func.func @transform_1(%arg0: i32, %arg1: i32, %arg2: i32) -> (i32, i32, i32) {
    %c0_i32 = arith.constant 0 : i32
    %c0_i32_0 = arith.constant 0 : i32
    %c0_i32_1 = arith.constant 0 : i32
    return %arg1, %c0_i32, %c0_i32_0 : i32, i32, i32
  }
  func.func @transform_2(%arg0: i32, %arg1: i32, %arg2: i32) -> (i32, i32, i32) {
    %c0_i32 = arith.constant 0 : i32
    %c0_i32_0 = arith.constant 0 : i32
    %c0_i32_1 = arith.constant 0 : i32
    return %arg1, %c0_i32, %c0_i32_0 : i32, i32, i32
  }
  func.func @transform_3(%arg0: i32, %arg1: i32, %arg2: i32) -> (i32, i32, i32, i32) {
    %c0_i32 = arith.constant 0 : i32
    %c0_i32_0 = arith.constant 0 : i32
    return %arg0, %arg1, %c0_i32, %arg2 : i32, i32, i32, i32
  }
}

</mosaic_0001>

<bundles_post_ra>
// kernel: tpu_custom_call.1
= control target key start
LH: loop header
LB: loop body
LE: loop exit
PB: predicated region body
PF: predicated region fallthrough
CT: control target
= control target key end

     0   :  { %8 = vsyncpa [#allocation3], 0  ;;  %s253_s0 = inlined_call_operand.vmem [shape: f32[2,1,4,16], index: 0, kind: input, shape index: {}]   ;;  %s254_s1 = inlined_call_operand.hbm [shape: f32[1,8,12], index: 1, kind: input, shape index: {}]   ;;  %s255_s2 = inlined_call_operand.vmem [shape: f32[1,8,1], index: 2, kind: input, shape index: {}]   ;;  %s256_s3 = inlined_call_operand.hbm [shape: f32[2,1,8,16], index: 3, kind: output, shape index: {}]  }
   0x1   :  { %9 = vsyncpa [#allocation4], 0  ;;  %s17_s14 = sshll.u32 %s254_s1, 4  ;;  %s210_s15 = smov [#allocation2]   ;;  %s18_s14 = int_to_ptr.hbm [resolvable:$true] %s17_s14 }
   0x2   :  { %s19_s16 = sshll.u32 %s210_s15, 4  ;;  %s20_s16 = int_to_ptr.vmem [resolvable:$true] %s19_s16 }
   0x3   :  { %22 = dma.hbm_to_vmem [thread:$0]  %s18_s14, 128, %s20_s16, [#allocation3]  }
   0x4   :  { %206 = dma.done.wait [#allocation3], 128  }
   0x5   :  { %207 = vsyncadd [#allocation3], 4294967168  ;;  %v31_v0 = vld [vmem:[%s253_s0] sm:$0xf]  ;;  %s211_s19 = smov 4   ;;  %vm36_vm0 = vcmask 31744  }
   0x6   :  { %33 = vrot.lane.b32.xlu0 %v31_v0, %s211_s19  ;;  %v140_v1 = vld [vmem:[%s253_s0 + $0x4] sm:$0xf]  ;;  %s212_s1 = smov 124   ;;  %s213_s22 = smov 126   ;;  %v214_v10 = vmov 0   ;;  %vm45_vm1 = vcmask 1043456  }
   0x7   :  { %v30_v9 = vld [vmem:[%s255_s2] sm:$0xff]  ;;  %156 = vset.pattern.permute.xlu2 %v214_v10  ;;  %157 = vset.pattern.permute.xlu0 %v214_v10  ;;  %vm52_vm2 = vcmask 97280   ;;  %vm78_vm3 = vcmask 130048   ;;  %s215_s0 = smov [#allocation5]   ;;  %s125_s27 = sshll.u32 %s256_s3, 4  ;;  %s126_s27 = int_to_ptr.hbm [resolvable:$true] %s125_s27 }
   0x8   :  { %v29_v14 = vld [vmem:[#allocation2] sm:$0xff]  ;;  %s123_s2 = sshll.u32 %s215_s0, 4  ;;  %s216_s28 = smov 128   ;;  %s124_s2 = int_to_ptr.vmem [resolvable:$true] %s123_s2 }
   0x9   :  { %s217_s29 = smov 8  }
   0xe   :  { %83 = vrot.lane.b32.xlu0 %v140_v1, %s211_s19 }
  0x78   :  { %v34_v2 = vpop.permute.xlu0 %33 }
  0x79   :  { %v37_v3 = vsel %vm36_vm0, 0.0, %v34_v2 }
  0x7a   :  { %43 = vrot.lane.b32.xlu1 %v37_v3, %s212_s1  ;;  %v39_v6 = vrot.slane %v37_v3, 4 }
  0x80   :  { %v84_v4 = vpop.permute.xlu0 %83 }
  0x81   :  { %v86_v5 = vsel %vm36_vm0, 0.0, %v84_v4 }
  0x82   :  { %v88_v7 = vrot.slane %v86_v5, 4  ;;  %92 = vrot.lane.b32.xlu1 %v86_v5, %s212_s1 }
  0x84   :  { %v151_v8 = vpack.i.bf16 %v88_v7, %v39_v6 }
  0x86   :  { %152 = vrot.lane.b32.xlu2 %v151_v8, %s213_s22 }
  0x8e   :  { %49 = vperm.xlu2 %156, %v30_v9  }
  0xe0   :  { %v153_v11 = vpop.permute.xlu2 %152 }
  0xe1   :  { %v154_v12 = vunpack.i.l.bf16 %v153_v11  ;;  %v155_v16 = vunpack.i.h.bf16 %v153_v11 }
  0xe3   :  { %v46_v15 = vsel %vm45_vm1, %v37_v3, %v154_v12  ;;  %v94_v18 = vsel %vm45_vm1, %v86_v5, %v155_v16 }
  0xe8   :  { %v50_v19 = vpop.permute.xlu2 %49 }
  0xec   :  { %v44_v13 = vpop.permute.xlu1 %43 }
  0xed   :  { %138 = vmatpush.msk.msra.mxu0 %vm45_vm1, %v44_v13 }
  0xef   :  { %73 = vmatpush.msra.mxu0 %v46_v15 }
  0xf0   :  { %139 = vmatmul.msk.f32.vlgmr.msra.gmra.mxu0 %vm52_vm2, %v29_v14 }
  0xf4   :  { %v93_v17 = vpop.permute.xlu1 %92 }
  0xf5   :  { %141 = vmatpush.msk.msra.mxu1 %vm45_vm1, %v93_v17 }
  0xf7   :  { %112 = vmatpush.msra.mxu1 %v94_v18 }
  0xf8   :  { %142 = vmatmul.msk.f32.vlgmr.msra.gmra.mxu1 %vm52_vm2, %v29_v14 }
 0x16d   :  { %v75_v20 = vpop.f32.mrf.mxu0 }
 0x16e   :  { %v76_v21 = vadd.f32 %v75_v20, %v50_v19 }
 0x170   :  { %79 = vst.msk [vmem:[#allocation5] sm:$0xff] %vm78_vm3, %v76_v21 }
 0x175   :  { %v114_v22 = vpop.f32.mrf.mxu1 }
 0x176   :  { %v115_v23 = vadd.f32 %v114_v22, %v50_v19 }
 0x178   :  { %118 = vst.msk [vmem:[#allocation5 + $0x8] sm:$0xff] %vm78_vm3, %v115_v23 }
 0x179   :  { %131 = dma.vmem_to_hbm [thread:$0]  %s124_s2, 256, %s126_s27, [#allocation4], %s216_s28, %s216_s28, %s217_s29  }
 0x17a   :  { %208 = dma.done.wait [#allocation4], 256  }
 0x17b   :  { %209 = vsyncadd [#allocation4], 4294967040 }
 0x17c   :  { %136 = vsyncpa [#allocation3], 1 }
 0x17d   :  { %137 = vsyncpa [#allocation4], 1 }

</bundles_post_ra>
